<compile_context>
chip_gen: v7x
topology: tpu7x:2x2x1
jax: 0.10.0
libtpu: 0.0.40
codegen_flags: <defaults>
</compile_context>

<pallas_src>
import jax
import jax.numpy as jnp
from jax.experimental import pallas as pl
from jax.experimental.pallas import tpu as pltpu


CHUNK = 256              # batch lanes processed per inner-loop step (2 vregs wide)
SINGLE_BLOCK_MAX = 2048  # largest padded batch handled grid-free in one block
MAX_TILE = 8192          # per-grid-step tile width for large batches


def _round_up(n, m):
    return ((n + m - 1) // m) * m


def _policy_kernel(x_ref, w1_ref, b1_ref, w2_ref, b2_ref, o_ref):
    # x_ref : (1, TB)        batch tile, lane-dense
    # w1_ref: (H, CHUNK)     affine1 weight, pre-broadcast along lanes
    # b1_ref: (H, CHUNK)     affine1 bias, pre-broadcast along lanes
    # w2_ref: (1, H)         output weight row
    # b2_ref: (1, 1)         output bias scalar (SMEM)
    # o_ref : (1, TB)        lane-dense output tile
    hidden, chunk = w1_ref.shape
    tile_w = x_ref.shape[-1]
    n_chunks = tile_w // chunk

    w2_row = w2_ref[...]          # (1, H)
    b2 = b2_ref[0, 0]             # scalar from SMEM

    def compute_chunk(start):
        x_c = x_ref[:, pl.ds(start, chunk)]                          # (1, chunk)
        # Hidden layer: rank-1 outer product via VPU broadcast FMA + ReLU.
        # w1/b1 arrive pre-broadcast, so these are plain vector loads.
        h = jnp.maximum(w1_ref[...] * x_c + b1_ref[...], 0.0)        # (H, chunk)
        # Output contraction on the (otherwise idle) MXU; HIGHEST precision
        # keeps f32 parity with the pure-JAX reference.
        z = jax.lax.dot_general(
            w2_row, h,
            dimension_numbers=(((1,), (0,)), ((), ())),
            preferred_element_type=jnp.float32,
            precision=jax.lax.Precision.HIGHEST,
        ) + b2                                                        # (1, chunk)
        # Sigmoid via tanh on the EUP slot: sigmoid(z) = 0.5*(tanh(z/2)+1).
        o_ref[:, pl.ds(start, chunk)] = (
            0.5 * (jnp.tanh(0.5 * z) + 1.0)).astype(o_ref.dtype)

    if n_chunks == 1:
        compute_chunk(0)
    else:
        def body(i, carry):
            compute_chunk(pl.multiple_of(i * chunk, chunk))
            return carry
        jax.lax.fori_loop(0, n_chunks, body, 0, unroll=min(n_chunks, 4))


def policy_forward(x, w1, b1, w2, b2):
    """x: (B,) or (B, 1) float32 -> (B, 1) float32.

    Computes sigmoid(relu(x @ W1 + b1) @ W2 + b2) with W1:(1,H), b1:(1,H),
    W2:(H,1), b2:(1,1) (the torch module with weights in (in, out) layout).
    """
    x = jnp.asarray(x, jnp.float32).reshape(-1)
    B = x.shape[0]
    hidden = int(jnp.asarray(w1).size)   # hidden width (128)

    # Kernel-side layouts: batch on lanes; w1/b1 pre-broadcast to (H, CHUNK)
    # so the inner chunk loop never re-materializes a lane broadcast.
    w1_b = jnp.broadcast_to(
        jnp.asarray(w1, jnp.float32).reshape(hidden, 1), (hidden, CHUNK))
    b1_b = jnp.broadcast_to(
        jnp.asarray(b1, jnp.float32).reshape(hidden, 1), (hidden, CHUNK))
    w2_row = jnp.asarray(w2, jnp.float32).reshape(1, hidden)
    b2_s = jnp.asarray(b2, jnp.float32).reshape(1, 1)

    # Pad the batch only to a CHUNK multiple (single jnp.pad, no zeros+scatter).
    b_pad = _round_up(max(B, 1), CHUNK)
    x_row = jnp.pad(x.reshape(1, B), ((0, 0), (0, b_pad - B)))

    out_shape = jax.ShapeDtypeStruct((1, b_pad), jnp.float32)
    vmem = pltpu.MemorySpace.VMEM
    smem = pltpu.MemorySpace.SMEM

    if b_pad <= SINGLE_BLOCK_MAX:
        # Everything fits in one block: no grid at all (no per-step overhead).
        y_row = pl.pallas_call(
            _policy_kernel,
            out_shape=out_shape,
            in_specs=[
                pl.BlockSpec(memory_space=vmem),   # x
                pl.BlockSpec(memory_space=vmem),   # w1 (pre-broadcast)
                pl.BlockSpec(memory_space=vmem),   # b1 (pre-broadcast)
                pl.BlockSpec(memory_space=vmem),   # w2 row
                pl.BlockSpec(memory_space=smem),   # b2 scalar
            ],
            out_specs=pl.BlockSpec(memory_space=vmem),
        )(x_row, w1_b, b1_b, w2_row, b2_s)
    else:
        # Large batch: tile the lane axis.  Use big tiles (amortize the ~0.35us
        # grid-step overhead) but always >= 2 tiles so v7x's two TensorCores
        # both get work; the last block may be ragged (Pallas masks it).
        tile_b = min(MAX_TILE, _round_up(pl.cdiv(b_pad, 2), CHUNK))
        n_tiles = pl.cdiv(b_pad, tile_b)
        y_row = pl.pallas_call(
            _policy_kernel,
            out_shape=out_shape,
            grid=(n_tiles,),
            in_specs=[
                pl.BlockSpec((1, tile_b), lambda i: (0, i)),        # x tile
                pl.BlockSpec((hidden, CHUNK), lambda i: (0, 0)),    # w1 (resident)
                pl.BlockSpec((hidden, CHUNK), lambda i: (0, 0)),    # b1 (resident)
                pl.BlockSpec((1, hidden), lambda i: (0, 0)),        # w2 (resident)
                pl.BlockSpec(memory_space=smem),                    # b2 scalar
            ],
            out_specs=pl.BlockSpec((1, tile_b), lambda i: (0, i)),
            compiler_params=pltpu.CompilerParams(
                dimension_semantics=("parallel",)   # shard tiles across TCs (v7x)
            ),
        )(x_row, w1_b, b1_b, w2_row, b2_s)

    return y_row[0, :B].reshape(B, 1)


def init_params(key, in_dim=1, hidden=128, out_dim=1):
    """Deterministic init mimicking torch.nn.Linear default (uniform +-1/sqrt(fan_in))."""
    k1, k2, k3, k4 = jax.random.split(key, 4)
    bound1 = 1.0 / jnp.sqrt(in_dim)
    bound2 = 1.0 / jnp.sqrt(hidden)
    w1 = jax.random.uniform(k1, (in_dim, hidden), jnp.float32, -bound1, bound1)
    b1 = jax.random.uniform(k2, (1, hidden), jnp.float32, -bound1, bound1)
    w2 = jax.random.uniform(k3, (hidden, out_dim), jnp.float32, -bound2, bound2)
    b2 = jax.random.uniform(k4, (1, out_dim), jnp.float32, -bound2, bound2)
    return w1, b1, w2, b2


def policy_ref(x, w1, b1, w2, b2):
    """Pure-JAX reference (same math as the torch module)."""
    x = jnp.asarray(x, jnp.float32).reshape(-1, 1)                   # (B, 1)
    h = jnp.maximum(x * w1 + b1, 0.0)                                # (B, H)
    z = jnp.sum(h * w2.reshape(1, -1), axis=-1, keepdims=True) + b2.reshape(1, 1)
    return jax.nn.sigmoid(z)                                         # (B, 1)


if __name__ == "__main__":
    key = jax.random.PRNGKey(0)
    pkey, xkey, xkey2 = jax.random.split(key, 3)
    w1, b1, w2, b2 = init_params(pkey)
    fwd = jax.jit(policy_forward)

    # Small batch of scalar observations (exercises the grid-free single block).
    B = 8
    x = jax.random.normal(xkey, (B, 1), jnp.float32)
    y = jax.block_until_ready(fwd(x, w1, b1, w2, b2))
    y_ref = policy_ref(x, w1, b1, w2, b2)
    assert y.shape == (B, 1)
    assert jnp.allclose(y, y_ref, atol=1e-4), "small-batch mismatch vs reference"

    # Larger batch (exercises the tiled, ragged-last-block, 'parallel' grid path).
    B2 = 5000
    x2 = jax.random.normal(xkey2, (B2, 1), jnp.float32)
    y2 = jax.block_until_ready(fwd(x2, w1, b1, w2, b2))
    y2_ref = policy_ref(x2, w1, b1, w2, b2)
    assert y2.shape == (B2, 1)
    assert jnp.allclose(y2, y2_ref, atol=1e-4), "large-batch mismatch vs reference"

    # Single-scalar case matching torch.from_numpy(np.array([x])).float() exactly.
    x_single = jnp.array([[0.5]], dtype=jnp.float32)                 # (1, 1)
    y_single = jax.block_until_ready(fwd(x_single, w1, b1, w2, b2))
    assert y_single.shape == (1, 1)
    assert jnp.allclose(y_single, policy_ref(x_single, w1, b1, w2, b2), atol=1e-4)

    print("KERNEL_OK")
</pallas_src>

<mosaic_0001>
module attributes {stable_mosaic.version = 11 : i64} {
  func.func @_policy_kernel(%arg0: memref<1x256xf32, #tpu.memory_space<vmem>>, %arg1: memref<128x256xf32, #tpu.memory_space<vmem>>, %arg2: memref<128x256xf32, #tpu.memory_space<vmem>>, %arg3: memref<1x128xf32, #tpu.memory_space<vmem>>, %arg4: memref<1x1xf32, #tpu.memory_space<smem>>, %arg5: memref<1x256xf32, #tpu.memory_space<vmem>>) attributes {dimension_semantics = [], scalar_prefetch = 0 : i64, scratch_operands = 0 : i64, tpu.core_type = #tpu.core_type<tc>} {
    %c0 = arith.constant 0 : index
    %c0_0 = arith.constant 0 : index
    %0 = vector.load %arg3[%c0, %c0_0] : memref<1x128xf32, #tpu.memory_space<vmem>>, vector<1x128xf32>
    %c0_1 = arith.constant 0 : index
    %c0_2 = arith.constant 0 : index
    %1 = memref.load %arg4[%c0_1, %c0_2] : memref<1x1xf32, #tpu.memory_space<smem>>
    %c0_3 = arith.constant 0 : index
    %c0_4 = arith.constant 0 : index
    %2 = vector.load %arg0[%c0_3, %c0_4] : memref<1x256xf32, #tpu.memory_space<vmem>>, vector<1x256xf32>
    %c0_5 = arith.constant 0 : index
    %c0_6 = arith.constant 0 : index
    %3 = vector.load %arg1[%c0_5, %c0_6] : memref<128x256xf32, #tpu.memory_space<vmem>>, vector<128x256xf32>
    %4 = vector.broadcast %2 : vector<1x256xf32> to vector<128x256xf32>
    %5 = arith.mulf %3, %4 : vector<128x256xf32>
    %c0_7 = arith.constant 0 : index
    %c0_8 = arith.constant 0 : index
    %6 = vector.load %arg2[%c0_7, %c0_8] : memref<128x256xf32, #tpu.memory_space<vmem>>, vector<128x256xf32>
    %7 = arith.addf %5, %6 : vector<128x256xf32>
    %cst = arith.constant 0.000000e+00 : f32
    %8 = vector.broadcast %cst : f32 to vector<128x256xf32>
    %9 = arith.maximumf %7, %8 : vector<128x256xf32>
    %cst_9 = arith.constant dense<0.000000e+00> : vector<1x256xf32>
    %10 = tpu.matmul %0, %9, %cst_9 {dimension_numbers = #tpu.dot_dimension_numbers<[1], [0], [0], [1], [0, 0, 1, 1], [], []>, precision = #tpu.contract_precision<fp32>} : vector<1x128xf32>, vector<128x256xf32>, vector<1x256xf32> -> vector<1x256xf32>
    %11 = vector.broadcast %1 : f32 to vector<1x256xf32>
    %12 = arith.addf %10, %11 : vector<1x256xf32>
    %cst_10 = arith.constant 5.000000e-01 : f32
    %13 = vector.broadcast %cst_10 : f32 to vector<1x256xf32>
    %14 = arith.mulf %13, %12 : vector<1x256xf32>
    %15 = math.tanh %14 : vector<1x256xf32>
    %cst_11 = arith.constant 1.000000e+00 : f32
    %16 = vector.broadcast %cst_11 : f32 to vector<1x256xf32>
    %17 = arith.addf %15, %16 : vector<1x256xf32>
    %cst_12 = arith.constant 5.000000e-01 : f32
    %18 = vector.broadcast %cst_12 : f32 to vector<1x256xf32>
    %19 = arith.mulf %18, %17 : vector<1x256xf32>
    %c0_13 = arith.constant 0 : index
    %c0_14 = arith.constant 0 : index
    %20 = vector.load %arg5[%c0_13, %c0_14] : memref<1x256xf32, #tpu.memory_space<vmem>>, vector<1x256xf32>
    tpu.vector_store %arg5[%c0_13, %c0_14], %19 {strides = array<i32>} : memref<1x256xf32, #tpu.memory_space<vmem>>, vector<1x256xf32>,
    return
  }
}

</mosaic_0001>

<bundles_post_ra>
// kernel: policy_forward.1
= control target key start
LH: loop header
LB: loop body
LE: loop exit
PB: predicated region body
PF: predicated region fallthrough
CT: control target
= control target key end

     0   :  { %v1866_v0 = vlaneseq  ;;  %v1867_v1 = vmov 0.0   ;;  %s1860_s0 = inlined_call_operand.vmem [shape: f32[1,256], index: 0, kind: input, shape index: {}]   ;;  %s1861_s1 = inlined_call_operand.vmem [shape: f32[128,256], index: 1, kind: input, shape index: {}]   ;;  %s1862_s2 = inlined_call_operand.vmem [shape: f32[128,256], index: 2, kind: input, shape index: {}]   ;;  %s1863_s3 = inlined_call_operand.vmem [shape: f32[1,128], index: 3, kind: input, shape index: {}]   ;;  %s1864_s4 = inlined_call_operand.<no memory space> [shape: f32[1,1], index: 4, kind: input, shape index: {}]   ;;  %s1865_s5 = inlined_call_operand.vmem [shape: f32[1,256], index: 5, kind: output, shape index: {}]  }
   0x1   :  { %292 = vmatprep.mubr.f32.mxu1 %v1867_v1  ;;  %769 = vmatprep.mubr.f32.mxu0 %v1867_v1  ;;  %v23_v3 = vld [vmem:[%s1860_s0] sm:$0x3]  ;;  %v25_v4 = vld [vmem:[%s1861_s1 + $0x8] sm:$0xff]  ;;  %v27_v5 = vld [vmem:[%s1861_s1 + $0x18] sm:$0xff] }
   0x2   :  { %v1331_v2 = vshrl.u32 %v1866_v0, 7  ;;  %v100_v8 = vld [vmem:[%s1862_s2 + $0x8] sm:$0xff]  ;;  %v102_v9 = vld [vmem:[%s1862_s2 + $0x18] sm:$0xff]  ;;  %v24_v10 = vld [vmem:[%s1861_s1] sm:$0xff] }
   0x3   :  { %v26_v11 = vld [vmem:[%s1861_s1 + $0x10] sm:$0xff]  ;;  %v29_v12 = vld [vmem:[%s1861_s1 + $0x28] sm:$0xff]  ;;  %v31_v15 = vld [vmem:[%s1861_s1 + $0x38] sm:$0xff] }
   0x4   :  { %1882 = vst [vmem:[#allocation3_spill] sm:$0xff] %v1331_v2  ;;  %v63_v6 = vsub.s32 1, %v1331_v2  ;;  %v59_v7 = vsub.s32 0, %v1331_v2  ;;  %v28_v16 = vld [vmem:[%s1861_s1 + $0x20] sm:$0xff]  ;;  %v30_v17 = vld [vmem:[%s1861_s1 + $0x30] sm:$0xff]  ;;  %v104_v20 = vld [vmem:[%s1862_s2 + $0x28] sm:$0xff] }
   0x5   :  { %v99_v18 = vld [vmem:[%s1862_s2] sm:$0xff]  ;;  %v101_v19 = vld [vmem:[%s1862_s2 + $0x10] sm:$0xff]  ;;  %v106_v25 = vld [vmem:[%s1862_s2 + $0x38] sm:$0xff] }
   0x6   :  { %v1359_v13 = vrot.slane %v23_v3, %v63_v6  ;;  %v1361_v14 = vrot.slane %v23_v3, %v59_v7  ;;  %v103_v26 = vld [vmem:[%s1862_s2 + $0x20] sm:$0xff]  ;;  %v105_v27 = vld [vmem:[%s1862_s2 + $0x30] sm:$0xff]  ;;  %v33_v56 = vld [vmem:[%s1861_s1 + $0x48] sm:$0xff] }
   0x7   :  { %v35_v61 = vld [vmem:[%s1861_s1 + $0x58] sm:$0xff]  ;;  %v108_v62 = vld [vmem:[%s1862_s2 + $0x48] sm:$0xff]  ;;  %v32_v7 = vld [vmem:[%s1861_s1 + $0x40] sm:$0xff] }
   0x8   :  { %v68_v21 = vmul.f32 %v1359_v13, %v25_v4  ;;  %v70_v22 = vmul.f32 %v1359_v13, %v27_v5  ;;  %v67_v23 = vmul.f32 %v1361_v14, %v24_v10  ;;  %v69_v24 = vmul.f32 %v1361_v14, %v26_v11  ;;  %v110_v63 = vld [vmem:[%s1862_s2 + $0x58] sm:$0xff]  ;;  %v49_v0 = vld [vmem:[%s1861_s1 + $0xc8] sm:$0xff]  ;;  %v127_v1 = vld [vmem:[%s1862_s2 + $0xe0] sm:$0xff] }
   0x9   :  { %v72_v28 = vmul.f32 %v1359_v13, %v29_v12  ;;  %v74_v29 = vmul.f32 %v1359_v13, %v31_v15  ;;  %v71_v30 = vmul.f32 %v1361_v14, %v28_v16  ;;  %v73_v31 = vmul.f32 %v1361_v14, %v30_v17  ;;  %v107_v15 = vld [vmem:[%s1862_s2 + $0x40] sm:$0xff]  ;;  %v39_v16 = vld [vmem:[%s1861_s1 + $0x78] sm:$0xff] }
   0xa   :  { %v132_v32 = vadd.f32 %v100_v8, %v68_v21  ;;  %v134_v33 = vadd.f32 %v102_v9, %v70_v22  ;;  %v131_v34 = vadd.f32 %v99_v18, %v67_v23  ;;  %v133_v35 = vadd.f32 %v101_v19, %v69_v24  ;;  %v34_v8 = vld [vmem:[%s1861_s1 + $0x50] sm:$0xff]  ;;  %v37_v9 = vld [vmem:[%s1861_s1 + $0x68] sm:$0xff]  ;;  %v36_v17 = vld [vmem:[%s1861_s1 + $0x60] sm:$0xff] }
   0xb   :  { %v136_v36 = vadd.f32 %v104_v20, %v72_v28  ;;  %v138_v37 = vadd.f32 %v106_v25, %v74_v29  ;;  %v135_v38 = vadd.f32 %v103_v26, %v71_v30  ;;  %v137_v39 = vadd.f32 %v105_v27, %v73_v31  ;;  %v109_v22 = vld [vmem:[%s1862_s2 + $0x50] sm:$0xff]  ;;  %v112_v23 = vld [vmem:[%s1862_s2 + $0x68] sm:$0xff]  ;;  %v114_v29 = vld [vmem:[%s1862_s2 + $0x78] sm:$0xff] }
   0xc   :  { %v164_v40 = vmax.f32 %v132_v32, 0.0  ;;  %v166_v41 = vmax.f32 %v134_v33, 0.0  ;;  %v163_v42 = vmax.f32 %v131_v34, 0.0  ;;  %v165_v43 = vmax.f32 %v133_v35, 0.0  ;;  %v38_v24 = vld [vmem:[%s1861_s1 + $0x70] sm:$0xff]  ;;  %v111_v30 = vld [vmem:[%s1862_s2 + $0x60] sm:$0xff] }
   0xd   :  { %v168_v44 = vmax.f32 %v136_v36, 0.0  ;;  %v170_v45 = vmax.f32 %v138_v37, 0.0  ;;  %v167_v46 = vmax.f32 %v135_v38, 0.0  ;;  %v169_v47 = vmax.f32 %v137_v39, 0.0  ;;  %v113_v36 = vld [vmem:[%s1862_s2 + $0x70] sm:$0xff] }
   0xe   :  { %v196_v48 = vand.u32 4294901760, %v164_v40  ;;  %v200_v49 = vand.u32 4294901760, %v166_v41  ;;  %v198_v50 = vand.u32 4294901760, %v163_v42  ;;  %v202_v51 = vand.u32 4294901760, %v165_v43 }
   0xf   :  { %v204_v52 = vand.u32 4294901760, %v168_v44  ;;  %v208_v53 = vand.u32 4294901760, %v170_v45  ;;  %v206_v54 = vand.u32 4294901760, %v167_v46  ;;  %v210_v55 = vand.u32 4294901760, %v169_v47 }
  0x10   :  { %v1401_v57 = vpack.c.bf16 %v200_v49, %v196_v48  ;;  %v1403_v58 = vsub.f32 %v164_v40, %v196_v48  ;;  %v1405_v59 = vsub.f32 %v166_v41, %v200_v49  ;;  %v1407_v60 = vpack.c.bf16 %v202_v51, %v198_v50 }
  0x11   :  { %v1418_v3 = vsub.f32 %v163_v42, %v198_v50  ;;  %v1420_v4 = vsub.f32 %v165_v43, %v202_v51  ;;  %v1422_v5 = vpack.c.bf16 %v208_v53, %v204_v52  ;;  %v1424_v6 = vsub.f32 %v168_v44, %v204_v52 }
  0x12   :  { %1087 = vmatprep.subr.bf16.mxu1 %v1401_v57  ;;  %1183 = vmatprep.subr.bf16.mxu0 %v1401_v57  ;;  %v1437_v10 = vsub.f32 %v170_v45, %v208_v53  ;;  %v1439_v11 = vpack.c.bf16 %v210_v55, %v206_v54  ;;  %v1441_v12 = vsub.f32 %v167_v46, %v206_v54 }
  0x13   :  { %1089 = vmatpush1.bf16.msra.mxu1 %v1407_v60  ;;  %1185 = vmatpush1.bf16.msra.mxu0 %v1407_v60  ;;  %v1455_v19 = vsub.f32 %v169_v47, %v210_v55  ;;  %v76_v20 = vmul.f32 %v1359_v13, %v33_v56  ;;  %v78_v21 = vmul.f32 %v1359_v13, %v35_v61  ;;  %v41_v61 = vld [vmem:[%s1861_s1 + $0x88] sm:$0xff] }
  0x14   :  { %1091 = vmatprep.subr.bf16.mxu1 %v1422_v5  ;;  %1187 = vmatprep.subr.bf16.mxu0 %v1422_v5  ;;  %v75_v26 = vmul.f32 %v1361_v14, %v32_v7  ;;  %v77_v27 = vmul.f32 %v1361_v14, %v34_v8  ;;  %v80_v28 = vmul.f32 %v1359_v13, %v37_v9  ;;  %v43_v9 = vld [vmem:[%s1861_s1 + $0x98] sm:$0xff] }
  0x15   :  { %v140_v32 = vadd.f32 %v108_v62, %v76_v20  ;;  %v142_v33 = vadd.f32 %v110_v63, %v78_v21  ;;  %v82_v34 = vmul.f32 %v1359_v13, %v39_v16  ;;  %v79_v35 = vmul.f32 %v1361_v14, %v36_v17  ;;  %v1507_v16 = vld [vmem:[%s1863_s3] sm:$0x1] }
  0x16   :  { %v139_v37 = vadd.f32 %v107_v15, %v75_v26  ;;  %v141_v38 = vadd.f32 %v109_v22, %v77_v27  ;;  %v144_v39 = vadd.f32 %v112_v23, %v80_v28  ;;  %v81_v40 = vmul.f32 %v1361_v14, %v38_v24  ;;  %v40_v15 = vld [vmem:[%s1861_s1 + $0x80] sm:$0xff]  ;;  %v116_v23 = vld [vmem:[%s1862_s2 + $0x88] sm:$0xff]  ;;  %v118_v24 = vld [vmem:[%s1862_s2 + $0x98] sm:$0xff] }
  0x17   :  { %1093 = vmatpush1.bf16.msra.mxu1 %v1439_v11  ;;  %1189 = vmatpush1.bf16.msra.mxu0 %v1439_v11  ;;  %v172_v41 = vmax.f32 %v140_v32, 0.0  ;;  %v174_v42 = vmax.f32 %v142_v33, 0.0  ;;  %v146_v43 = vadd.f32 %v114_v29, %v82_v34  ;;  %v143_v44 = vadd.f32 %v111_v30, %v79_v35  ;;  %v42_v30 = vld [vmem:[%s1861_s1 + $0x90] sm:$0xff]  ;;  %v115_v32 = vld [vmem:[%s1862_s2 + $0x80] sm:$0xff]  ;;  %v45_v33 = vld [vmem:[%s1861_s1 + $0xa8] sm:$0xff] }
  0x18   :  { %v171_v45 = vmax.f32 %v139_v37, 0.0  ;;  %v173_v46 = vmax.f32 %v141_v38, 0.0  ;;  %v176_v47 = vmax.f32 %v144_v39, 0.0  ;;  %v145_v48 = vadd.f32 %v113_v36, %v81_v40  ;;  %v47_v37 = vld [vmem:[%s1861_s1 + $0xb8] sm:$0xff]  ;;  %v44_v38 = vld [vmem:[%s1861_s1 + $0xa0] sm:$0xff]  ;;  %v46_v39 = vld [vmem:[%s1861_s1 + $0xb0] sm:$0xff] }
  0x19   :  { %v212_v49 = vand.u32 4294901760, %v172_v41  ;;  %v216_v50 = vand.u32 4294901760, %v174_v42  ;;  %v178_v51 = vmax.f32 %v146_v43, 0.0  ;;  %v175_v52 = vmax.f32 %v143_v44, 0.0  ;;  %v117_v44 = vld [vmem:[%s1862_s2 + $0x90] sm:$0xff] }
  0x1a   :  { %v214_v53 = vand.u32 4294901760, %v171_v45  ;;  %v218_v54 = vand.u32 4294901760, %v173_v46  ;;  %v220_v55 = vand.u32 4294901760, %v176_v47  ;;  %v177_v56 = vmax.f32 %v145_v48, 0.0 }
  0x1b   :  { %v1492_v62 = vpack.c.bf16 %v216_v50, %v212_v49  ;;  %v1494_v63 = vsub.f32 %v172_v41, %v212_v49  ;;  %v1496_v7 = vsub.f32 %v174_v42, %v216_v50  ;;  %v224_v8 = vand.u32 4294901760, %v178_v51 }
  0x1c   :  { %v1509_v17 = vpack.c.bf16 %v218_v54, %v214_v53  ;;  %v1511_v20 = vsub.f32 %v171_v45, %v214_v53  ;;  %v1513_v21 = vsub.f32 %v173_v46, %v218_v54  ;;  %v1515_v22 = vsub.f32 %v176_v47, %v220_v55  ;;  %v120_v45 = vld [vmem:[%s1862_s2 + $0xa8] sm:$0xff]  ;;  %v121_v53 = vld [vmem:[%s1862_s2 + $0xb0] sm:$0xff] }
  0x1d   :  { %1095 = vmatprep.subr.bf16.mxu1 %v1492_v62  ;;  %1191 = vmatprep.subr.bf16.mxu0 %v1492_v62  ;;  %v1525_v26 = vpack.c.bf16 %v224_v8, %v220_v55  ;;  %v1527_v27 = vsub.f32 %v178_v51, %v224_v8  ;;  %v222_v28 = vand.u32 4294901760, %v175_v52  ;;  %v226_v29 = vand.u32 4294901760, %v177_v56  ;;  %v122_v51 = vld [vmem:[%s1862_s2 + $0xb8] sm:$0xff] }
  0x1e   :  { %1097 = vmatpush1.bf16.msra.mxu1 %v1509_v17  ;;  %1193 = vmatpush1.bf16.msra.mxu0 %v1509_v17  ;;  %v84_v34 = vmul.f32 %v1359_v13, %v41_v61  ;;  %v86_v35 = vmul.f32 %v1359_v13, %v43_v9  ;;  %v83_v36 = vmul.f32 %v1361_v14, %v40_v15  ;;  %v1553_v40 = vand.u32 4294901760, %v1507_v16 }
  0x1f   :  { %1883 = vst [vmem:[#allocation4_spill] sm:$0xff] %v1525_v26  ;;  %1099 = vmatprep.subr.bf16.mxu1 %v1525_v26  ;;  %1195 = vmatprep.subr.bf16.mxu0 %v1525_v26  ;;  %v1557_v41 = vpack.c.bf16 %v226_v29, %v222_v28  ;;  %v1559_v42 = vsub.f32 %v175_v52, %v222_v28  ;;  %v119_v52 = vld [vmem:[%s1862_s2 + $0xa0] sm:$0xff] }
  0x20   :  { %v1561_v43 = vsub.f32 %v177_v56, %v226_v29  ;;  %v148_v47 = vadd.f32 %v116_v23, %v84_v34  ;;  %v150_v48 = vadd.f32 %v118_v24, %v86_v35  ;;  %v85_v49 = vmul.f32 %v1361_v14, %v42_v30 }
  0x21   :  { %1884 = vst [vmem:[#allocation5_spill] sm:$0xff] %v1557_v41  ;;  %v147_v50 = vadd.f32 %v115_v32, %v83_v36  ;;  %v88_v54 = vmul.f32 %v1359_v13, %v45_v33  ;;  %v90_v55 = vmul.f32 %v1359_v13, %v47_v37  ;;  %v87_v56 = vmul.f32 %v1361_v14, %v44_v38 }
  0x22   :  { %v89_v61 = vmul.f32 %v1361_v14, %v46_v39  ;;  %1101 = vmatpush1.bf16.msra.mxu1 %v1557_v41  ;;  %1197 = vmatpush1.bf16.msra.mxu0 %v1557_v41  ;;  %v180_v8 = vmax.f32 %v148_v47, 0.0  ;;  %v182_v9 = vmax.f32 %v150_v48, 0.0  ;;  %v149_v15 = vadd.f32 %v117_v44, %v85_v49 }
  0x23   :  { %v179_v23 = vmax.f32 %v147_v50, 0.0  ;;  %v152_v24 = vadd.f32 %v120_v45, %v88_v54  ;;  %v154_v28 = vadd.f32 %v122_v51, %v90_v55  ;;  %v151_v29 = vadd.f32 %v119_v52, %v87_v56  ;;  %v124_v54 = vld [vmem:[%s1862_s2 + $0xc8] sm:$0xff] }
  0x24   :  { %v153_v30 = vadd.f32 %v121_v53, %v89_v61  ;;  %v228_v32 = vand.u32 4294901760, %v180_v8  ;;  %v232_v33 = vand.u32 4294901760, %v182_v9  ;;  %v181_v34 = vmax.f32 %v149_v15, 0.0  ;;  %v51_v53 = vld [vmem:[%s1861_s1 + $0xd8] sm:$0xff]  ;;  %v48_v15 = vld [vmem:[%s1861_s1 + $0xc0] sm:$0xff] }
  0x25   :  { %v230_v35 = vand.u32 4294901760, %v179_v23  ;;  %v184_v36 = vmax.f32 %v152_v24, 0.0  ;;  %v186_v37 = vmax.f32 %v154_v28, 0.0  ;;  %v183_v38 = vmax.f32 %v151_v29, 0.0 }
  0x26   :  { %v185_v39 = vmax.f32 %v153_v30, 0.0  ;;  %v1589_v47 = vpack.c.bf16 %v232_v33, %v228_v32  ;;  %v1591_v44 = vsub.f32 %v180_v8, %v228_v32  ;;  %v1593_v45 = vsub.f32 %v182_v9, %v232_v33  ;;  %v126_v9 = vld [vmem:[%s1862_s2 + $0xd8] sm:$0xff]  ;;  %v52_v33 = vld [vmem:[%s1861_s1 + $0xe0] sm:$0xff] }
  0x27   :  { %v234_v48 = vand.u32 4294901760, %v181_v34  ;;  %v1595_v49 = vsub.f32 %v179_v23, %v230_v35  ;;  %v236_v50 = vand.u32 4294901760, %v184_v36  ;;  %v240_v51 = vand.u32 4294901760, %v186_v37  ;;  %v50_v23 = vld [vmem:[%s1861_s1 + $0xd0] sm:$0xff]  ;;  %v55_v32 = vld [vmem:[%s1861_s1 + $0xf8] sm:$0xff] }
  0x28   :  { %1885 = vst [vmem:[#allocation6_spill] sm:$0xff] %v1589_v47  ;;  %v238_v52 = vand.u32 4294901760, %v183_v38  ;;  %1103 = vmatprep.subr.bf16.mxu1 %v1589_v47  ;;  %1199 = vmatprep.subr.bf16.mxu0 %v1589_v47  ;;  %v242_v61 = vand.u32 4294901760, %v185_v39  ;;  %v92_v8 = vmul.f32 %v1359_v13, %v49_v0  ;;  %v53_v0 = vld [vmem:[%s1861_s1 + $0xe8] sm:$0xff] }
  0x29   :  { %v1605_v55 = vpack.c.bf16 %v234_v48, %v230_v35  ;;  %v1607_v56 = vsub.f32 %v181_v34, %v234_v48  ;;  %v1619_v24 = vpack.c.bf16 %v240_v51, %v236_v50  ;;  %v1621_v28 = vsub.f32 %v184_v36, %v236_v50  ;;  %v54_v48 = vld [vmem:[%s1861_s1 + $0xf0] sm:$0xff] }
  0x2a   :  { %v1623_v29 = vsub.f32 %v186_v37, %v240_v51  ;;  %v1625_v30 = vsub.f32 %v183_v38, %v238_v52  ;;  %v1638_v34 = vpack.c.bf16 %v242_v61, %v238_v52  ;;  %v1640_v35 = vsub.f32 %v185_v39, %v242_v61  ;;  %v123_v37 = vld [vmem:[%s1862_s2 + $0xc0] sm:$0xff]  ;;  %v125_v38 = vld [vmem:[%s1862_s2 + $0xd0] sm:$0xff]  ;;  %v130_v61 = vld [vmem:[%s1862_s2 + $0xf8] sm:$0xff] }
  0x2b   :  { %1886 = vst [vmem:[#allocation7_spill] sm:$0xff] %v1605_v55  ;;  %1887 = vst [vmem:[#allocation8_spill] sm:$0xff] %v1619_v24  ;;  %1105 = vmatpush1.bf16.msra.mxu1 %v1605_v55  ;;  %1201 = vmatpush1.bf16.msra.mxu0 %v1605_v55  ;;  %v94_v36 = vmul.f32 %v1359_v13, %v51_v53  ;;  %v156_v39 = vadd.f32 %v124_v54, %v92_v8  ;;  %v128_v53 = vld [vmem:[%s1862_s2 + $0xe8] sm:$0xff] }
  0x2c   :  { %1888 = vst [vmem:[#allocation9_spill] sm:$0xff] %v1638_v34  ;;  %1107 = vmatprep.subr.bf16.mxu1 %v1619_v24  ;;  %1203 = vmatprep.subr.bf16.mxu0 %v1619_v24  ;;  %v91_v51 = vmul.f32 %v1361_v14, %v48_v15  ;;  %v93_v52 = vmul.f32 %v1361_v14, %v50_v23  ;;  %v129_v23 = vld [vmem:[%s1862_s2 + $0xf0] sm:$0xff] }
  0x2d   :  { %v158_v46 = vadd.f32 %v126_v9, %v94_v36  ;;  %v96_v54 = vmul.f32 %v1359_v13, %v53_v0  ;;  %v98_v8 = vmul.f32 %v1359_v13, %v55_v32  ;;  %v95_v15 = vmul.f32 %v1361_v14, %v52_v33 }
  0x2e   :  { %v188_v31 = vmax.f32 %v156_v39, 0.0  ;;  %v155_v25 = vadd.f32 %v123_v37, %v91_v51  ;;  %v157_v18 = vadd.f32 %v125_v38, %v93_v52  ;;  %v97_v2 = vmul.f32 %v1361_v14, %v54_v48 }
  0x2f   :  { %1109 = vmatpush1.bf16.msra.mxu1 %v1638_v34  ;;  %1205 = vmatpush1.bf16.msra.mxu0 %v1638_v34  ;;  %v190_v9 = vmax.f32 %v158_v46, 0.0  ;;  %v160_v36 = vadd.f32 %v128_v53, %v96_v54  ;;  %v162_v0 = vadd.f32 %v130_v61, %v98_v8  ;;  %v159_v50 = vadd.f32 %v127_v1, %v95_v15 }
  0x30   :  { %v244_v13 = vand.u32 4294901760, %v188_v31  ;;  %v187_v32 = vmax.f32 %v155_v25, 0.0  ;;  %v189_v33 = vmax.f32 %v157_v18, 0.0  ;;  %v161_v24 = vadd.f32 %v129_v23, %v97_v2 }
  0x31   :  { %v248_v55 = vand.u32 4294901760, %v190_v9  ;;  %v192_v47 = vmax.f32 %v160_v36, 0.0  ;;  %v194_v41 = vmax.f32 %v162_v0, 0.0  ;;  %v191_v39 = vmax.f32 %v159_v50, 0.0 }
  0x32   :  { %v1676_v37 = vsub.f32 %v188_v31, %v244_v13  ;;  %v246_v38 = vand.u32 4294901760, %v187_v32  ;;  %v250_v14 = vand.u32 4294901760, %v189_v33  ;;  %v193_v48 = vmax.f32 %v161_v24, 0.0 }
  0x33   :  { %v1678_v51 = vpack.c.bf16 %v248_v55, %v244_v13  ;;  %v1680_v52 = vsub.f32 %v190_v9, %v248_v55  ;;  %v252_v46 = vand.u32 4294901760, %v192_v47  ;;  %v256_v53 = vand.u32 4294901760, %v194_v41 }
  0x34   :  { %v1682_v1 = vpack.c.bf16 %v250_v14, %v246_v38  ;;  %v1684_v25 = vsub.f32 %v187_v32, %v246_v38  ;;  %v1686_v2 = vsub.f32 %v189_v33, %v250_v14  ;;  %v254_v18 = vand.u32 4294901760, %v191_v39 }
  0x35   :  { %1889 = vst [vmem:[#allocation10_spill] sm:$0xff] %v1678_v51  ;;  %1111 = vmatprep.subr.bf16.mxu1 %v1678_v51  ;;  %1207 = vmatprep.subr.bf16.mxu0 %v1678_v51  ;;  %v1690_v31 = vpack.c.bf16 %v256_v53, %v252_v46  ;;  %v1692_v24 = vsub.f32 %v192_v47, %v252_v46  ;;  %v258_v55 = vand.u32 4294901760, %v193_v48  ;;  %v1893_v54 = vand.u32 4294901760, %v1403_v58 }
  0x36   :  { %1890 = vst [vmem:[#allocation11_spill] sm:$0xff] %v1682_v1  ;;  %1891 = vst [vmem:[#allocation12_spill] sm:$0xff] %v1686_v2  ;;  %v1694_v50 = vsub.f32 %v194_v41, %v256_v53  ;;  %1113 = vmatpush1.bf16.msra.mxu1 %v1682_v1  ;;  %1209 = vmatpush1.bf16.msra.mxu0 %v1682_v1  ;;  %v1698_v61 = vsub.f32 %v191_v39, %v254_v18  ;;  %v1894_v15 = vand.u32 4294901760, %v1405_v59 }
  0x37   :  { %1892 = vst [vmem:[#allocation13_spill] sm:$0xff] %v1690_v31  ;;  %v307_v8 = vsub.f32 %v1403_v58, %v1893_v54  ;;  %v336_v47 = vand.u32 4294901760, %v1441_v12  ;;  %1115 = vmatprep.subr.bf16.mxu1 %v1690_v31  ;;  %1211 = vmatprep.subr.bf16.mxu0 %v1690_v31  ;;  %v1709_v41 = vpack.c.bf16 %v258_v55, %v254_v18  ;;  %v1896_v36 = vmov %v1893_v54 }
  0x38   :  { %v319_v23 = vsub.f32 %v1405_v59, %v1894_v15  ;;  %v1711_v9 = vsub.f32 %v193_v48, %v258_v55  ;;  %v1897_v0 = vmov %v1894_v15  ;;  %v348_v32 = vand.u32 4294901760, %v1455_v19 }
  0x39   :  { %1895 = vst [vmem:[#allocation14_spill] sm:$0xff] %v1709_v41  ;;  %v1214_v13 = vpack.c.bf16 %v1897_v0, %v1896_v36  ;;  %v308_v33 = vand.u32 4294901760, %v307_v8  ;;  %v1720_v38 = vsub.f32 %v1507_v16, %v1553_v40  ;;  %v1899_v14 = vand.u32 4294901760, %v1418_v3 }
  0x3a   :  { %v320_v39 = vand.u32 4294901760, %v319_v23  ;;  %v1900_v48 = vand.u32 4294901760, %v1420_v4  ;;  %v1903_v8 = vand.u32 4294901760, %v1424_v6  ;;  %v1904_v16 = vand.u32 4294901760, %v1437_v10  ;;  %1117 = vmatpush1.bf16.msra.mxu1 %v1709_v41  ;;  %1213 = vmatpush1.bf16.msra.mxu0 %v1709_v41 }
  0x3b   :  { %1898 = vst [vmem:[#allocation15_spill] sm:$0xff] %v1720_v38  ;;  %v313_v46 = vsub.f32 %v1418_v3, %v1899_v14  ;;  %v1901_v18 = vmov %v1899_v14  ;;  %v295_v0 = vand.u32 4294901760, %v1720_v38  ;;  %1215 = vmatprep.subr.bf16.mxu0 %v1214_v13  ;;  %v337_v51 = vsub.f32 %v1441_v12, %v336_v47 }
  0x3c   :  { %v325_v53 = vsub.f32 %v1420_v4, %v1900_v48  ;;  %v1902_v55 = vmov %v1900_v48  ;;  %v331_v15 = vsub.f32 %v1424_v6, %v1903_v8  ;;  %v343_v23 = vsub.f32 %v1437_v10, %v1904_v16 }
  0x3d   :  { %v1216_v54 = vpack.c.bf16 %v1902_v55, %v1901_v18  ;;  %v1118_v36 = vpack.c.bf16 %v320_v39, %v308_v33  ;;  %v314_v14 = vand.u32 4294901760, %v313_v46  ;;  %v1905_v48 = vmov %v1903_v8  ;;  %773 = vmatmul.mubr.f32.vlgmr.msra.gmra.mrb[0].mxu0 %v295_v0 }
  0x3e   :  { %v1906_v18 = vmov %v1904_v16  ;;  %v326_v31 = vand.u32 4294901760, %v325_v53  ;;  %v332_v8 = vand.u32 4294901760, %v331_v15  ;;  %v344_v1 = vand.u32 4294901760, %v343_v23 }
  0x3f   :  { %v1218_v55 = vpack.c.bf16 %v1906_v18, %v1905_v48  ;;  %1119 = vmatprep.subr.bf16.mxu1 %v1118_v36  ;;  %v296_v16 = vsub.f32 %v1720_v38, %v295_v0  ;;  %v349_v41 = vsub.f32 %v1455_v19, %v348_v32  ;;  %v1220_v33 = vpack.c.bf16 %v348_v32, %v336_v47 }
  0x40   :  { %v354_v39 = vand.u32 4294901760, %v1494_v63  ;;  %v1120_v46 = vpack.c.bf16 %v326_v31, %v314_v14  ;;  %v1122_v34 = vpack.c.bf16 %v344_v1, %v332_v8  ;;  %v338_v26 = vand.u32 4294901760, %v337_v51  ;;  %1217 = vmatpush1.bf16.msra.mxu0 %v1216_v54 }
  0x41   :  { %v366_v48 = vand.u32 4294901760, %v1496_v7  ;;  %v297_v13 = vand.u32 4294901760, %v296_v16  ;;  %v350_v53 = vand.u32 4294901760, %v349_v41  ;;  %v360_v23 = vand.u32 4294901760, %v1511_v20  ;;  %1219 = vmatprep.subr.bf16.mxu0 %v1218_v55 }
  0x42   :  { %v355_v15 = vsub.f32 %v1494_v63, %v354_v39  ;;  %v1907_v36 = vmov 0.0   ;;  %v372_v31 = vand.u32 4294901760, %v1513_v21  ;;  %v378_v1 = vand.u32 4294901760, %v1515_v22 }
  0x43   :  { %939 = vmatprep.mubr.f32.mxu0 %v1907_v36  ;;  %v367_v47 = vsub.f32 %v1496_v7, %v366_v48  ;;  %v1222_v32 = vpack.c.bf16 %v366_v48, %v354_v39  ;;  %298 = vmatmul.mubr.f32.vlgmr.msra.gmra.mrb[0].mxu1 %v297_v13  ;;  %v1124_v51 = vpack.c.bf16 %v350_v53, %v338_v26  ;;  %v390_v41 = vand.u32 4294901760, %v1527_v27 }
  0x44   :  { %v356_v0 = vand.u32 4294901760, %v355_v15  ;;  %v361_v54 = vsub.f32 %v1511_v20, %v360_v23  ;;  %1121 = vmatpush1.bf16.msra.mxu1 %v1120_v46  ;;  %v373_v18 = vsub.f32 %v1513_v21, %v372_v31  ;;  %v1224_v8 = vpack.c.bf16 %v372_v31, %v360_v23  ;;  %528 = vmatprep.mubr.f32.mxu1 %v1907_v36 }
  0x45   :  { %v368_v14 = vand.u32 4294901760, %v367_v47  ;;  %v379_v55 = vsub.f32 %v1515_v22, %v378_v1  ;;  %1123 = vmatprep.subr.bf16.mxu1 %v1122_v34  ;;  %1221 = vmatpush1.bf16.msra.mxu0 %v1220_v33  ;;  %v391_v39 = vsub.f32 %v1527_v27, %v390_v41  ;;  %v1226_v26 = vpack.c.bf16 %v390_v41, %v378_v1 }
  0x46   :  { %v362_v16 = vand.u32 4294901760, %v361_v54  ;;  %v384_v48 = vand.u32 4294901760, %v1559_v42  ;;  %1223 = vmatprep.subr.bf16.mxu0 %v1222_v32  ;;  %v374_v53 = vand.u32 4294901760, %v373_v18  ;;  %v396_v15 = vand.u32 4294901760, %v1561_v43 }
  0x47   :  { %v1126_v13 = vpack.c.bf16 %v368_v14, %v356_v0  ;;  %v380_v46 = vand.u32 4294901760, %v379_v55  ;;  %v392_v47 = vand.u32 4294901760, %v391_v39  ;;  %v402_v31 = vand.u32 4294901760, %v1591_v44 }
  0x48   :  { %v385_v23 = vsub.f32 %v1559_v42, %v384_v48  ;;  %v414_v34 = vand.u32 4294901760, %v1593_v45  ;;  %1125 = vmatpush1.bf16.msra.mxu1 %v1124_v51  ;;  %v1128_v33 = vpack.c.bf16 %v374_v53, %v362_v16  ;;  %v397_v54 = vsub.f32 %v1561_v43, %v396_v15 }
  0x49   :  { %v1228_v1 = vpack.c.bf16 %v396_v15, %v384_v48  ;;  %v408_v41 = vand.u32 4294901760, %v1595_v49  ;;  %1127 = vmatprep.subr.bf16.mxu1 %v1126_v13  ;;  %1225 = vmatpush1.bf16.msra.mxu0 %v1224_v8  ;;  %v1130_v32 = vpack.c.bf16 %v392_v47, %v380_v46  ;;  %v403_v14 = vsub.f32 %v1591_v44, %v402_v31 }
  0x4a   :  { %v386_v0 = vand.u32 4294901760, %v385_v23  ;;  %v415_v18 = vsub.f32 %v1593_v45, %v414_v34  ;;  %1227 = vmatprep.subr.bf16.mxu0 %v1226_v26  ;;  %v398_v55 = vand.u32 4294901760, %v397_v54  ;;  %v1230_v39 = vpack.c.bf16 %v414_v34, %v402_v31 }
  0x4b   :  { %v409_v38 = vsub.f32 %v1595_v49, %v408_v41  ;;  %v420_v51 = vand.u32 4294901760, %v1607_v56  ;;  %v404_v16 = vand.u32 4294901760, %v403_v14  ;;  %v426_v48 = vand.u32 4294901760, %v1621_v28 }
  0x4c   :  { %v416_v53 = vand.u32 4294901760, %v415_v18  ;;  %v438_v13 = vand.u32 4294901760, %v1623_v29  ;;  %1129 = vmatpush1.bf16.msra.mxu1 %v1128_v33  ;;  %v1132_v8 = vpack.c.bf16 %v398_v55, %v386_v0  ;;  %v432_v34 = vand.u32 4294901760, %v1625_v30 }
  0x4d   :  { %v410_v46 = vand.u32 4294901760, %v409_v38  ;;  %v421_v15 = vsub.f32 %v1607_v56, %v420_v51  ;;  %v1232_v47 = vpack.c.bf16 %v420_v51, %v408_v41  ;;  %1131 = vmatprep.subr.bf16.mxu1 %v1130_v32  ;;  %1229 = vmatpush1.bf16.msra.mxu0 %v1228_v1  ;;  %v427_v23 = vsub.f32 %v1621_v28, %v426_v48 }
  0x4e   :  { %v1134_v26 = vpack.c.bf16 %v416_v53, %v404_v16  ;;  %v439_v31 = vsub.f32 %v1623_v29, %v438_v13  ;;  %1231 = vmatprep.subr.bf16.mxu0 %v1230_v39  ;;  %v1234_v14 = vpack.c.bf16 %v438_v13, %v426_v48  ;;  %v444_v18 = vand.u32 4294901760, %v1640_v35 }
  0x4f   :  { %v422_v54 = vand.u32 4294901760, %v421_v15  ;;  %v450_v33 = vand.u32 4294901760, %v1676_v37  ;;  %v428_v38 = vand.u32 4294901760, %v427_v23  ;;  %v433_v41 = vsub.f32 %v1625_v30, %v432_v34 }
  0x50   :  { %v440_v0 = vand.u32 4294901760, %v439_v31  ;;  %v462_v1 = vand.u32 4294901760, %v1680_v52  ;;  %1133 = vmatpush1.bf16.msra.mxu1 %v1132_v8  ;;  %v445_v55 = vsub.f32 %v1640_v35, %v444_v18  ;;  %v1236_v51 = vpack.c.bf16 %v444_v18, %v432_v34 }
  0x51   :  { %v1136_v32 = vpack.c.bf16 %v422_v54, %v410_v46  ;;  %v451_v16 = vsub.f32 %v1676_v37, %v450_v33  ;;  %1135 = vmatprep.subr.bf16.mxu1 %v1134_v26  ;;  %1233 = vmatpush1.bf16.msra.mxu0 %v1232_v47  ;;  %v434_v53 = vand.u32 4294901760, %v433_v41  ;;  %v456_v31 = vand.u32 4294901760, %v1684_v25 }
  0x52   :  { %v1138_v39 = vpack.c.bf16 %v440_v0, %v428_v38  ;;  %v463_v48 = vsub.f32 %v1680_v52, %v462_v1  ;;  %v1238_v13 = vpack.c.bf16 %v462_v1, %v450_v33  ;;  %1235 = vmatprep.subr.bf16.mxu0 %v1234_v14  ;;  %v446_v15 = vand.u32 4294901760, %v445_v55 }
  0x53   :  { %v452_v23 = vand.u32 4294901760, %v451_v16  ;;  %v468_v8 = vand.u32 4294901760, %v1686_v2  ;;  %v474_v54 = vand.u32 4294901760, %v1692_v24  ;;  %v486_v34 = vand.u32 4294901760, %v1694_v50 }
  0x54   :  { %v464_v46 = vand.u32 4294901760, %v463_v48  ;;  %v480_v26 = vand.u32 4294901760, %v1698_v61  ;;  %1137 = vmatpush1.bf16.msra.mxu1 %v1136_v32  ;;  %v1140_v47 = vpack.c.bf16 %v446_v15, %v434_v53  ;;  %v457_v18 = vsub.f32 %v1684_v25, %v456_v31 }
  0x55   :  { %v469_v33 = vsub.f32 %v1686_v2, %v468_v8  ;;  %v1240_v14 = vpack.c.bf16 %v468_v8, %v456_v31  ;;  %1139 = vmatprep.subr.bf16.mxu1 %v1138_v39  ;;  %1237 = vmatpush1.bf16.msra.mxu0 %v1236_v51  ;;  %v475_v0 = vsub.f32 %v1692_v24, %v474_v54  ;;  %v492_v1 = vand.u32 4294901760, %v1711_v9 }
  0x56   :  { %v1142_v38 = vpack.c.bf16 %v464_v46, %v452_v23  ;;  %v487_v41 = vsub.f32 %v1694_v50, %v486_v34  ;;  %1239 = vmatprep.subr.bf16.mxu0 %v1238_v13  ;;  %v458_v55 = vand.u32 4294901760, %v457_v18  ;;  %v1242_v48 = vpack.c.bf16 %v486_v34, %v474_v54 }
  0x57   :  { %v470_v16 = vand.u32 4294901760, %v469_v33  ;;  %v481_v32 = vsub.f32 %v1698_v61, %v480_v26  ;;  %v476_v53 = vand.u32 4294901760, %v475_v0  ;;  %v493_v2 = vsub.f32 %v1711_v9, %v492_v1 }
  0x58   :  { %v488_v15 = vand.u32 4294901760, %v487_v41  ;;  %1141 = vmatpush1.bf16.msra.mxu1 %v1140_v47  ;;  %v1244_v8 = vpack.c.bf16 %v492_v1, %v480_v26  ;;  %v1150_v46 = vpack.c.bf16 %v1405_v59, %v1403_v58  ;;  %v1152_v54 = vpack.c.bf16 %v1420_v4, %v1418_v3  ;;  %v1908_v3 = vld [vmem:[#allocation4_spill] sm:$0xff] }
  0x59   :  { %v1144_v39 = vpack.c.bf16 %v470_v16, %v458_v55  ;;  %v482_v51 = vand.u32 4294901760, %v481_v32  ;;  %1143 = vmatprep.subr.bf16.mxu1 %v1142_v38  ;;  %1241 = vmatpush1.bf16.msra.mxu0 %v1240_v14  ;;  %v494_v31 = vand.u32 4294901760, %v493_v2  ;;  %v1154_v2 = vpack.c.bf16 %v1437_v10, %v1424_v6  ;;  %v1910_v10 = vld [vmem:[#allocation6_spill] sm:$0xff]  ;;  %v1920_v38 = vld [vmem:[#allocation3_spill] sm:$0xff] }
  0x5a   :  { %v1146_v23 = vpack.c.bf16 %v488_v15, %v476_v53  ;;  %1243 = vmatprep.subr.bf16.mxu0 %v1242_v48  ;;  %v1158_v58 = vpack.c.bf16 %v1496_v7, %v1494_v63  ;;  %v1160_v59 = vpack.c.bf16 %v1513_v21, %v1511_v20  ;;  %v1164_v4 = vpack.c.bf16 %v1561_v43, %v1559_v42  ;;  %v1913_v7 = vld [vmem:[#allocation9_spill] sm:$0xff]  ;;  %v1914_v20 = vld [vmem:[#allocation10_spill] sm:$0xff]  ;;  %v1915_v21 = vld [vmem:[#allocation12_spill] sm:$0xff] }
  0x5b   :  { %v1148_v13 = vpack.c.bf16 %v494_v31, %v482_v51  ;;  %v1166_v6 = vpack.c.bf16 %v1593_v45, %v1591_v44  ;;  %v1172_v63 = vpack.c.bf16 %v1640_v35, %v1625_v30  ;;  %v1178_v42 = vpack.c.bf16 %v1694_v50, %v1692_v24  ;;  %v1917_v43 = vld [vmem:[#allocation13_spill] sm:$0xff]  ;;  %v1918_v45 = vld [vmem:[#allocation14_spill] sm:$0xff] }
  0x5c   :  { %1145 = vmatpush1.bf16.msra.mxu1 %v1144_v39  ;;  %v1180_v44 = vpack.c.bf16 %v1711_v9, %v1698_v61  ;;  %v1297_v9 = vmov 1966171168   ;;  %v1921_v55 = vlaneseq }
  0x5d   :  { %1147 = vmatprep.subr.bf16.mxu1 %v1146_v23  ;;  %1245 = vmatpush1.bf16.msra.mxu0 %v1244_v8 }
  0x5e   :  { %1247 = vmatprep.subr.bf16.mxu0 %v1401_v57  ;;  %v1156_v57 = vpack.c.bf16 %v1455_v19, %v1441_v12  ;;  %v1911_v12 = vld [vmem:[#allocation7_spill] sm:$0xff]  ;;  %v1170_v19 = vpack.c.bf16 %v1623_v29, %v1621_v28  ;;  %v195_v28 = vstv %s1864_s4  ;;  %vm1079_vm0 = vcmp.lt.s32.totalorder %v1921_v55, 256 }
  0x60   :  { %1149 = vmatpush1.bf16.msra.mxu1 %v1148_v13  ;;  %941 = vmatmul.mubr.f32.vlgmr.msra.gmra.mrb[0].mxu0 %v1553_v40 }
  0x61   :  { %1151 = vmatprep.subr.bf16.mxu1 %v1150_v46  ;;  %1249 = vmatpush1.bf16.msra.mxu0 %v1407_v60  ;;  %v1162_v60 = vpack.c.bf16 %v1527_v27, %v1515_v22  ;;  %v1176_v22 = vpack.c.bf16 %v1915_v21, %v1684_v25  ;;  %v1916_v27 = vld [vmem:[#allocation11_spill] sm:$0xff] }
  0x62   :  { %1251 = vmatprep.subr.bf16.mxu0 %v1422_v5  ;;  %1043 = vmatprep.mubr.f32.mxu0 %v1907_v36  ;;  %v1909_v5 = vld [vmem:[#allocation5_spill] sm:$0xff] }
  0x63   :  { %530 = vmatmul.mubr.f32.vlgmr.msra.gmra.mrb[0].mxu1 %v1553_v40 }
  0x64   :  { %1153 = vmatpush1.bf16.msra.mxu1 %v1152_v54  ;;  %664 = vmatprep.mubr.f32.mxu1 %v1907_v36 }
  0x65   :  { %1155 = vmatprep.subr.bf16.mxu1 %v1154_v2  ;;  %1253 = vmatpush1.bf16.msra.mxu0 %v1439_v11  ;;  %v1168_v11 = vpack.c.bf16 %v1607_v56, %v1595_v49  ;;  %v1919_v49 = vld [vmem:[#allocation15_spill] sm:$0xff] }
  0x66   :  { %1255 = vmatprep.subr.bf16.mxu0 %v1492_v62  ;;  %v1912_v62 = vld [vmem:[#allocation8_spill] sm:$0xff] }
  0x68   :  { %1157 = vmatpush1.bf16.msra.mxu1 %v1156_v57 }
  0x69   :  { %1159 = vmatprep.subr.bf16.mxu1 %v1158_v58  ;;  %1257 = vmatpush1.bf16.msra.mxu0 %v1509_v17  ;;  %v1174_v17 = vpack.c.bf16 %v1680_v52, %v1676_v37 }
  0x6a   :  { %1259 = vmatprep.subr.bf16.mxu0 %v1908_v3 }
  0x6c   :  { %1161 = vmatpush1.bf16.msra.mxu1 %v1160_v59 }
  0x6d   :  { %1163 = vmatprep.subr.bf16.mxu1 %v1162_v60  ;;  %1261 = vmatpush1.bf16.msra.mxu0 %v1909_v5 }
  0x6e   :  { %1263 = vmatprep.subr.bf16.mxu0 %v1910_v10 }
  0x70   :  { %1165 = vmatpush1.bf16.msra.mxu1 %v1164_v4 }
  0x71   :  { %1167 = vmatprep.subr.bf16.mxu1 %v1166_v6  ;;  %1265 = vmatpush1.bf16.msra.mxu0 %v1911_v12 }
  0x72   :  { %1267 = vmatprep.subr.bf16.mxu0 %v1912_v62 }
  0x74   :  { %1169 = vmatpush1.bf16.msra.mxu1 %v1168_v11 }
  0x75   :  { %1171 = vmatprep.subr.bf16.mxu1 %v1170_v19  ;;  %1269 = vmatpush1.bf16.msra.mxu0 %v1913_v7 }
  0x76   :  { %1271 = vmatprep.subr.bf16.mxu0 %v1914_v20 }
  0x78   :  { %1173 = vmatpush1.bf16.msra.mxu1 %v1172_v63 }
  0x79   :  { %1175 = vmatprep.subr.bf16.mxu1 %v1174_v17  ;;  %1273 = vmatpush1.bf16.msra.mxu0 %v1916_v27 }
  0x7a   :  { %1275 = vmatprep.subr.bf16.mxu0 %v1917_v43 }
  0x7c   :  { %1177 = vmatpush1.bf16.msra.mxu1 %v1176_v22 }
  0x7d   :  { %1179 = vmatprep.subr.bf16.mxu1 %v1178_v42  ;;  %1277 = vmatpush1.bf16.msra.mxu0 %v1918_v45 }
  0x80   :  { %1181 = vmatpush1.bf16.msra.mxu1 %v1180_v44  ;;  %1045 = vmatmul.mubr.f32.vlgmr.msra.gmra.mrb[0].mxu0 %v1553_v40  ;;  %v1063_v40 = vunpack.c.l.s4 %v1297_v9 }
  0x82   :  { %v1064_v34 = vunpack.c.0.s8 %v1063_v40 }
  0x83   :  { %667 = vmatmul.mubr.f32.vlgmr.msra.gmra.mrb[0].mxu1 %v1919_v49 }
  0x84   :  { %v1067_v0 = vsub.s32 %v1064_v34, %v1920_v38 }
 0x153   :  { %v1046_v56 = vpop.f32.mrb[0].mxu0 }
 0x154   :  { %v1048_v29 = vpop.f32.mrb[1].mxu0 }
 0x156   :  { %v668_v30 = vpop.f32.mrb[0].mxu1 }
 0x157   :  { %v1278_v35 = vadd.f32 %v668_v30, %v195_v28  ;;  %v670_v37 = vpop.f32.mrb[1].mxu1 }
 0x158   :  { %v1280_v52 = vadd.f32 %v670_v37, %v195_v28 }
 0x159   :  { %v1279_v25 = vadd.f32 %v1278_v35, %v1046_v56 }
 0x15a   :  { %v1281_v24 = vadd.f32 %v1280_v52, %v1048_v29 }
 0x15b   :  { %v1051_v50 = vmul.f32 0.5, %v1279_v25 }
 0x15c   :  { %v1052_v61 = vmul.f32 0.5, %v1281_v24 }
 0x15d   :  { %1292 = vtanh.f32 %v1051_v50 }
 0x15e   :  { %1294 = vtanh.f32 %v1052_v61 }
 0x167   :  { %v1293_v36 = vpop.eup %1292 }
 0x168   :  { %v1295_v26 = vpop.eup %1294  ;;  %v1055_v47 = vadd.f32 1.0, %v1293_v36 }
 0x169   :  { %v1056_v18 = vadd.f32 1.0, %v1295_v26 }
 0x16a   :  { %v1057_v33 = vmul.f32 0.5, %v1055_v47 }
 0x16b   :  { %v1058_v14 = vmul.f32 0.5, %v1056_v18 }
 0x16d   :  { %v1061_v41 = vcombine.low %v1057_v33, %v1058_v14 }
 0x16f   :  { %v1068_v1 = vrot.slane %v1061_v41, %v1067_v0 }
 0x171   :  { %v1075_v16 = vrot.slane %v1068_v1, %v1067_v0 }
 0x173   :  { %1081 = vst.msk [vmem:[%s1865_s5] sm:$0x3] %vm1079_vm0, %v1075_v16 }

</bundles_post_ra>
